<compile_context>
chip_gen: v5e
topology: v5e:2x2
jax: 0.10.0
libtpu: 0.0.40
codegen_flags: <defaults>
</compile_context>

<pallas_src>
import functools

import jax
import jax.numpy as jnp
from jax.experimental import pallas as pl
from jax.experimental.pallas import tpu as pltpu

FEATURES = 32 * 32 * 3        # 3072
HIDDEN = 100
HIDDEN_PAD = 128              # lane-dense padding of the hidden dim (exact: ReLU(0)=0)
CLASSES = 10
CLASSES_PAD = 128             # lane-dense padding of the class/output dim
_NEG_BIG = -1e30              # finite "-inf" for padded class lanes (no NaN risk)


def mlp_kernel(x_ref, w1_ref, b1_ref, w2_ref, b2_ref, o_ref):
    # x arrives as f32 straight from HBM; cast to bf16 in-kernel (VPU work fully
    # hidden under the x DMA) so the MXU runs a bf16 matmul with f32 accumulation.
    x_bf = x_ref[...].astype(jnp.bfloat16)

    # fc1 + bias + ReLU
    h = jnp.dot(x_bf, w1_ref[...], preferred_element_type=jnp.float32)
    h = jnp.maximum(h + b1_ref[...], 0.0)              # (TB,128) + (1,128)

    # fc1_drop: Dropout(p=0.2) is identity in eval mode -> no-op.

    # fc3: padded W2 columns (>=10) are zero and padded b2 lanes are -1e30,
    # so padded class lanes vanish from the softmax sum.
    logits = jnp.dot(h, w2_ref[...], preferred_element_type=jnp.float32)
    logits = logits + b2_ref[...]                       # (TB,128) + (1,128)

    # numerically-stable log_softmax over the (padded) class dim
    m = jnp.max(logits, axis=-1, keepdims=True)
    shifted = logits - m
    lse = jnp.log(jnp.sum(jnp.exp(shifted), axis=-1, keepdims=True))
    o_ref[...] = (shifted - lse).astype(o_ref.dtype)    # lane-dense (TB,128) store


def prepare_params(w1, b1, w2, b2):
    """One-time (model-load) padding + casting into kernel layout.

    hidden 100 -> 128 zero-pad is mathematically exact (ReLU(0)=0, padded W2
    rows are zero); class 10 -> 128 pad uses zero W2 columns and a -1e30 bias
    so the padded lanes contribute exp(~-inf)=0 to the softmax.
    """
    w1p = jnp.zeros((FEATURES, HIDDEN_PAD), jnp.float32).at[:, :HIDDEN].set(w1)
    b1p = jnp.zeros((1, HIDDEN_PAD), jnp.float32).at[:, :HIDDEN].set(
        jnp.asarray(b1, jnp.float32).reshape(1, -1))
    w2p = jnp.zeros((HIDDEN_PAD, CLASSES_PAD), jnp.float32).at[:HIDDEN, :CLASSES].set(w2)
    b2p = jnp.full((1, CLASSES_PAD), _NEG_BIG, jnp.float32).at[:, :CLASSES].set(
        jnp.asarray(b2, jnp.float32).reshape(1, -1))
    return w1p.astype(jnp.bfloat16), b1p, w2p, b2p


def _round_up(n, m):
    return ((n + m - 1) // m) * m


@functools.partial(jax.jit, static_argnames=("tb",))
def mlp_forward(x_nchw, w1p_bf, b1p, w2p, b2p, *, tb=512):
    B = x_nchw.shape[0]
    x2d = x_nchw.reshape(B, FEATURES)                  # == x.view(-1, 3072)

    # Batch tile: multiple of 8 (f32 sublanes).  No jnp.pad of x: the ragged
    # last block is boundary-masked by Pallas; rows are independent so the tail
    # garbage never reaches the returned output.
    TB = min(tb, _round_up(B, 8))
    if B >= 4 * 128:
        # keep >= ~4 grid steps so v7x's two TensorCores both get batch tiles
        TB = min(TB, max(128, _round_up(pl.cdiv(B, 4), 8)))
    grid = (pl.cdiv(B, TB),)

    cost = pl.CostEstimate(
        flops=2 * B * FEATURES * HIDDEN_PAD + 2 * B * HIDDEN_PAD * CLASSES_PAD,
        transcendentals=B * CLASSES_PAD,
        bytes_accessed=(B * FEATURES * 4                # x (f32, dominant stream)
                        + FEATURES * HIDDEN_PAD * 2     # W1 (bf16, resident)
                        + HIDDEN_PAD * CLASSES_PAD * 4  # W2 (resident)
                        + (HIDDEN_PAD + CLASSES_PAD) * 4
                        + B * CLASSES_PAD * 4),         # lane-dense output
    )

    out = pl.pallas_call(
        mlp_kernel,
        out_shape=jax.ShapeDtypeStruct((B, CLASSES_PAD), jnp.float32),
        grid=grid,
        in_specs=[
            pl.BlockSpec((TB, FEATURES), lambda i: (i, 0)),             # x tile (streamed)
            pl.BlockSpec((FEATURES, HIDDEN_PAD), lambda i: (0, 0)),     # W1 resident
            pl.BlockSpec((1, HIDDEN_PAD), lambda i: (0, 0)),            # b1 resident
            pl.BlockSpec((HIDDEN_PAD, CLASSES_PAD), lambda i: (0, 0)),  # W2 resident
            pl.BlockSpec((1, CLASSES_PAD), lambda i: (0, 0)),           # b2 resident
        ],
        out_specs=pl.BlockSpec((TB, CLASSES_PAD), lambda i: (i, 0)),
        compiler_params=pltpu.CompilerParams(
            # TODO(synk): A/B pltpu.CORE_PARALLEL on v7x if "parallel" alone
            # does not shard the batch grid across its two TensorCores.
            dimension_semantics=("parallel",),
            vmem_limit_bytes=48 * 1024 * 1024,   # <= ~48 MiB keeps v7x (64 MiB VMEM) safe
        ),
        cost_estimate=cost,
    )(x2d, w1p_bf, b1p, w2p, b2p)

    return out[:, :CLASSES]


def init_params(key):
    # Deterministic init mimicking nn.Linear's uniform(-1/sqrt(fan_in), +1/sqrt(fan_in))
    k1, k2, k3, k4 = jax.random.split(key, 4)
    bound1 = 1.0 / jnp.sqrt(FEATURES)
    bound2 = 1.0 / jnp.sqrt(HIDDEN)
    w1 = jax.random.uniform(k1, (FEATURES, HIDDEN), jnp.float32, -bound1, bound1)
    b1 = jax.random.uniform(k2, (1, HIDDEN), jnp.float32, -bound1, bound1)
    w2 = jax.random.uniform(k3, (HIDDEN, CLASSES), jnp.float32, -bound2, bound2)
    b2 = jax.random.uniform(k4, (1, CLASSES), jnp.float32, -bound2, bound2)
    return w1, b1, w2, b2


if __name__ == "__main__":
    key = jax.random.PRNGKey(0)
    kx, kp = jax.random.split(key)

    B = 8
    x = jax.random.normal(kx, (B, 3, 32, 32), jnp.float32)   # NCHW like PyTorch
    w1, b1, w2, b2 = init_params(kp)

    # one-time param prep (padding + W1 bf16 cast) outside the per-call path
    w1p_bf, b1p, w2p, b2p = prepare_params(w1, b1, w2, b2)

    out = mlp_forward(x, w1p_bf, b1p, w2p, b2p)
    out = jax.block_until_ready(out)
    assert out.shape == (B, CLASSES)
    assert bool(jnp.all(jnp.isfinite(out)))

    # Reference 1: same bf16 fc1 math in pure JAX (tight tolerance)
    x2d = x.reshape(B, -1)
    h_bf = jnp.maximum(
        jnp.dot(x2d.astype(jnp.bfloat16), w1.astype(jnp.bfloat16),
                preferred_element_type=jnp.float32) + b1, 0.0)
    ref_bf16 = jax.nn.log_softmax(h_bf @ w2 + b2, axis=-1)
    assert jnp.allclose(out, ref_bf16, atol=1e-3, rtol=1e-3)

    # Reference 2: full-f32 PyTorch semantics (loose tolerance for bf16 fc1)
    h32 = jnp.maximum(x2d @ w1 + b1, 0.0)
    ref_f32 = jax.nn.log_softmax(h32 @ w2 + b2, axis=-1)
    assert jnp.allclose(out, ref_f32, atol=5e-2, rtol=5e-2)

    print("KERNEL_OK")
</pallas_src>

<mosaic_0001>
module attributes {stable_mosaic.version = 11 : i64} {
  func.func @mlp_kernel(%arg0: i32, %arg1: memref<8x3072xf32, #tpu.memory_space<vmem>>, %arg2: memref<3072x128xbf16, #tpu.memory_space<vmem>>, %arg3: memref<1x128xf32, #tpu.memory_space<vmem>>, %arg4: memref<128x128xf32, #tpu.memory_space<vmem>>, %arg5: memref<1x128xf32, #tpu.memory_space<vmem>>, %arg6: memref<8x128xf32, #tpu.memory_space<vmem>>) attributes {dimension_semantics = [#tpu.dimension_semantics<parallel>], iteration_bounds = array<i64: 1>, scalar_prefetch = 0 : i64, scratch_operands = 0 : i64, tpu.core_type = #tpu.core_type<tc>, window_params = [{transform_indices = @transform_0, window_bounds = array<i64: 8, 3072>}, {pipeline_mode = #tpu.pipeline_mode<synchronous>, transform_indices = @transform_1, window_bounds = array<i64: 3072, 128>}, {pipeline_mode = #tpu.pipeline_mode<synchronous>, transform_indices = @transform_2, window_bounds = array<i64: 1, 128>}, {pipeline_mode = #tpu.pipeline_mode<synchronous>, transform_indices = @transform_3, window_bounds = array<i64: 128, 128>}, {pipeline_mode = #tpu.pipeline_mode<synchronous>, transform_indices = @transform_4, window_bounds = array<i64: 1, 128>}, {transform_indices = @transform_5, window_bounds = array<i64: 8, 128>}]} {
    %c0 = arith.constant 0 : index
    %c0_0 = arith.constant 0 : index
    %0 = vector.load %arg1[%c0, %c0_0] : memref<8x3072xf32, #tpu.memory_space<vmem>>, vector<8x3072xf32>
    %1 = arith.truncf %0 : vector<8x3072xf32> to vector<8x3072xbf16>
    %c0_1 = arith.constant 0 : index
    %c0_2 = arith.constant 0 : index
    %2 = vector.load %arg2[%c0_1, %c0_2] : memref<3072x128xbf16, #tpu.memory_space<vmem>>, vector<3072x128xbf16>
    %cst = arith.constant dense<0.000000e+00> : vector<8x128xf32>
    %3 = tpu.matmul %1, %2, %cst {dimension_numbers = #tpu.dot_dimension_numbers<[1], [0], [0], [1], [0, 0, 1, 1], [], []>} : vector<8x3072xbf16>, vector<3072x128xbf16>, vector<8x128xf32> -> vector<8x128xf32>
    %c0_3 = arith.constant 0 : index
    %c0_4 = arith.constant 0 : index
    %4 = vector.load %arg3[%c0_3, %c0_4] : memref<1x128xf32, #tpu.memory_space<vmem>>, vector<1x128xf32>
    %5 = vector.broadcast %4 : vector<1x128xf32> to vector<8x128xf32>
    %6 = arith.addf %3, %5 : vector<8x128xf32>
    %cst_5 = arith.constant 0.000000e+00 : f32
    %7 = vector.broadcast %cst_5 : f32 to vector<8x128xf32>
    %8 = arith.maximumf %6, %7 : vector<8x128xf32>
    %c0_6 = arith.constant 0 : index
    %c0_7 = arith.constant 0 : index
    %9 = vector.load %arg4[%c0_6, %c0_7] : memref<128x128xf32, #tpu.memory_space<vmem>>, vector<128x128xf32>
    %cst_8 = arith.constant dense<0.000000e+00> : vector<8x128xf32>
    %10 = tpu.matmul %8, %9, %cst_8 {dimension_numbers = #tpu.dot_dimension_numbers<[1], [0], [0], [1], [0, 0, 1, 1], [], []>} : vector<8x128xf32>, vector<128x128xf32>, vector<8x128xf32> -> vector<8x128xf32>
    %c0_9 = arith.constant 0 : index
    %c0_10 = arith.constant 0 : index
    %11 = vector.load %arg5[%c0_9, %c0_10] : memref<1x128xf32, #tpu.memory_space<vmem>>, vector<1x128xf32>
    %12 = vector.broadcast %11 : vector<1x128xf32> to vector<8x128xf32>
    %13 = arith.addf %10, %12 : vector<8x128xf32>
    %cst_11 = arith.constant dense<0xFF800000> : vector<8xf32>
    %14 = vector.multi_reduction <maximumf>, %13, %cst_11 [1] : vector<8x128xf32> to vector<8xf32>
    %15 = vector.shape_cast %14 : vector<8xf32> to vector<8x1xf32>
    %16 = vector.broadcast %15 : vector<8x1xf32> to vector<8x128xf32>
    %17 = arith.subf %13, %16 : vector<8x128xf32>
    %18 = math.exp %17 : vector<8x128xf32>
    %cst_12 = arith.constant dense<0.000000e+00> : vector<8xf32>
    %19 = vector.multi_reduction <add>, %18, %cst_12 [1] : vector<8x128xf32> to vector<8xf32>
    %20 = vector.shape_cast %19 : vector<8xf32> to vector<8x1xf32>
    %21 = math.log %20 : vector<8x1xf32>
    %22 = vector.broadcast %21 : vector<8x1xf32> to vector<8x128xf32>
    %23 = arith.subf %17, %22 : vector<8x128xf32>
    %c0_13 = arith.constant 0 : index
    %c0_14 = arith.constant 0 : index
    %24 = vector.load %arg6[%c0_13, %c0_14] : memref<8x128xf32, #tpu.memory_space<vmem>>, vector<8x128xf32>
    tpu.vector_store %arg6[%c0_13, %c0_14], %23 {strides = array<i32>} : memref<8x128xf32, #tpu.memory_space<vmem>>, vector<8x128xf32>,
    return
  }
  func.func @transform_0(%arg0: i32) -> (i32, i32) {
    %c0_i32 = arith.constant 0 : i32
    %c0_i32_0 = arith.constant 0 : i32
    return %arg0, %c0_i32 : i32, i32
  }
  func.func @transform_1(%arg0: i32) -> (i32, i32) {
    %c0_i32 = arith.constant 0 : i32
    %c0_i32_0 = arith.constant 0 : i32
    %c0_i32_1 = arith.constant 0 : i32
    return %c0_i32, %c0_i32_0 : i32, i32
  }
  func.func @transform_2(%arg0: i32) -> (i32, i32) {
    %c0_i32 = arith.constant 0 : i32
    %c0_i32_0 = arith.constant 0 : i32
    %c0_i32_1 = arith.constant 0 : i32
    return %c0_i32, %c0_i32_0 : i32, i32
  }
  func.func @transform_3(%arg0: i32) -> (i32, i32) {
    %c0_i32 = arith.constant 0 : i32
    %c0_i32_0 = arith.constant 0 : i32
    %c0_i32_1 = arith.constant 0 : i32
    return %c0_i32, %c0_i32_0 : i32, i32
  }
  func.func @transform_4(%arg0: i32) -> (i32, i32) {
    %c0_i32 = arith.constant 0 : i32
    %c0_i32_0 = arith.constant 0 : i32
    %c0_i32_1 = arith.constant 0 : i32
    return %c0_i32, %c0_i32_0 : i32, i32
  }
  func.func @transform_5(%arg0: i32) -> (i32, i32) {
    %c0_i32 = arith.constant 0 : i32
    %c0_i32_0 = arith.constant 0 : i32
    return %arg0, %c0_i32 : i32, i32
  }
}

</mosaic_0001>

<bundles_post_ra>
// kernel: mlp_forward.1
= control target key start
LH: loop header
LB: loop body
LE: loop exit
PB: predicated region body
PF: predicated region fallthrough
CT: control target
= control target key end

     0   :  { %10 = vsyncpa [#allocation3], 0  ;;  %s3194_s0 = inlined_call_operand.vmem [shape: f32[8,3072], index: 0, kind: input, shape index: {}]   ;;  %s3195_s1 = inlined_call_operand.hbm [shape: bf16[3072,128], index: 1, kind: input, shape index: {}]   ;;  %s3196_s2 = inlined_call_operand.vmem [shape: f32[1,128], index: 2, kind: input, shape index: {}]   ;;  %s3197_s3 = inlined_call_operand.vmem [shape: f32[128,128], index: 3, kind: input, shape index: {}]   ;;  %s3198_s4 = inlined_call_operand.vmem [shape: f32[1,128], index: 4, kind: input, shape index: {}]   ;;  %s3199_s5 = inlined_call_operand.hbm [shape: f32[8,128], index: 5, kind: output, shape index: {}]  }
   0x1   :  { %11 = vsyncpa [#allocation4], 0  ;;  %s18_s20 = sshll.u32 %s3195_s1, 4  ;;  %s3028_s21 = smov [#allocation2]   ;;  %s19_s20 = int_to_ptr.hbm [resolvable:$true] %s18_s20 }
   0x2   :  { %s20_s22 = sshll.u32 %s3028_s21, 4  ;;  %s3029_s23 = smov 64   ;;  %s21_s22 = int_to_ptr.vmem [resolvable:$true] %s20_s22 }
   0x3   :  { %s3030_s24 = smov 4  }
   0x4   :  { %26 = dma.hbm_to_vmem [thread:$0]  %s19_s20, 24576, %s21_s22, [#allocation3], %s3029_s23, %s3029_s23, %s3030_s24  }
   0x5   :  { %3024 = dma.done.wait [#allocation3], 24576  }
   0x6   :  { %3025 = vsyncadd [#allocation3], 4294942720  ;;  %v2781_v0 = vld [vmem:[#allocation2 + $0x38] sm:$0xff]  ;;  %v2780_v4 = vld [vmem:[#allocation2 + $0x30] sm:$0xff]  ;;  %s3031_s25 = smov [#allocation5]   ;;  %s1996_s29 = sshll.u32 %s3199_s5, 4  ;;  %s1997_s29 = int_to_ptr.hbm [resolvable:$true] %s1996_s29 }
   0x7   :  { %v2789_v1 = vld [vmem:[#allocation2 + $0x78] sm:$0xff]  ;;  %1625 = vmatpush.bf16.msra.mxu0 %v2781_v0  ;;  %v2788_v5 = vld [vmem:[#allocation2 + $0x70] sm:$0xff]  ;;  %v2779_v8 = vld [vmem:[#allocation2 + $0x28] sm:$0xff]  ;;  %s1994_s26 = sshll.u32 %s3031_s25, 4  ;;  %s1995_s26 = int_to_ptr.vmem [resolvable:$true] %s1994_s26 }
   0x8   :  { %v2797_v2 = vld [vmem:[#allocation2 + $0xb8] sm:$0xff]  ;;  %1638 = vmatpush.bf16.msra.mxu1 %v2789_v1  ;;  %v2796_v6 = vld [vmem:[#allocation2 + $0xb0] sm:$0xff]  ;;  %v2787_v9 = vld [vmem:[#allocation2 + $0x68] sm:$0xff] }
   0x9   :  { %v2805_v3 = vld [vmem:[#allocation2 + $0xf8] sm:$0xff]  ;;  %1651 = vmatpush.bf16.msra.mxu2 %v2797_v2  ;;  %v2804_v7 = vld [vmem:[#allocation2 + $0xf0] sm:$0xff]  ;;  %v2795_v10 = vld [vmem:[#allocation2 + $0xa8] sm:$0xff] }
   0xa   :  { %1664 = vmatpush.bf16.msra.mxu3 %v2805_v3  ;;  %v2803_v11 = vld [vmem:[#allocation2 + $0xe8] sm:$0xff]  ;;  %v2778_v12 = vld [vmem:[#allocation2 + $0x20] sm:$0xff]  ;;  %v2777_v16 = vld [vmem:[#allocation2 + $0x18] sm:$0xff] }
   0xb   :  { %1626 = vmatpush.bf16.msra.mxu0 %v2780_v4  ;;  %v2786_v13 = vld [vmem:[#allocation2 + $0x60] sm:$0xff]  ;;  %v2785_v17 = vld [vmem:[#allocation2 + $0x58] sm:$0xff]  ;;  %v2776_v20 = vld [vmem:[#allocation2 + $0x10] sm:$0xff] }
   0xc   :  { %1639 = vmatpush.bf16.msra.mxu1 %v2788_v5  ;;  %v2794_v14 = vld [vmem:[#allocation2 + $0xa0] sm:$0xff]  ;;  %v2793_v18 = vld [vmem:[#allocation2 + $0x98] sm:$0xff]  ;;  %v2784_v21 = vld [vmem:[#allocation2 + $0x50] sm:$0xff] }
   0xd   :  { %1652 = vmatpush.bf16.msra.mxu2 %v2796_v6  ;;  %v2802_v15 = vld [vmem:[#allocation2 + $0xe0] sm:$0xff]  ;;  %v2801_v19 = vld [vmem:[#allocation2 + $0xd8] sm:$0xff]  ;;  %v2792_v22 = vld [vmem:[#allocation2 + $0x90] sm:$0xff] }
   0xe   :  { %1665 = vmatpush.bf16.msra.mxu3 %v2804_v7  ;;  %v2800_v23 = vld [vmem:[#allocation2 + $0xd0] sm:$0xff]  ;;  %v2775_v24 = vld [vmem:[#allocation2 + $0x8] sm:$0xff]  ;;  %v2774_v28 = vld [vmem:[#allocation2] sm:$0xff] }
   0xf   :  { %1627 = vmatpush.bf16.msra.mxu0 %v2779_v8  ;;  %v2783_v25 = vld [vmem:[#allocation2 + $0x48] sm:$0xff]  ;;  %v2782_v29 = vld [vmem:[#allocation2 + $0x40] sm:$0xff]  ;;  %v2813_v32 = vld [vmem:[#allocation2 + $0x138] sm:$0xff] }
  0x10   :  { %1640 = vmatpush.bf16.msra.mxu1 %v2787_v9  ;;  %v2791_v26 = vld [vmem:[#allocation2 + $0x88] sm:$0xff]  ;;  %v2790_v30 = vld [vmem:[#allocation2 + $0x80] sm:$0xff]  ;;  %v39_v33 = vld [vmem:[%s3194_s0 + $0x10] sm:$0xff] }
  0x11   :  { %1653 = vmatpush.bf16.msra.mxu2 %v2795_v10  ;;  %v2799_v27 = vld [vmem:[#allocation2 + $0xc8] sm:$0xff]  ;;  %v2798_v31 = vld [vmem:[#allocation2 + $0xc0] sm:$0xff]  ;;  %v2821_v35 = vld [vmem:[#allocation2 + $0x178] sm:$0xff]  ;;  %v63_v40 = vpack.c.bf16 %v39_v33, %v39_v33 }
  0x12   :  { %1666 = vmatpush.bf16.msra.mxu3 %v2803_v11  ;;  %v37_v34 = vld [vmem:[%s3194_s0] sm:$0xff]  ;;  %v40_v36 = vld [vmem:[%s3194_s0 + $0x18] sm:$0xff]  ;;  %v38_v37 = vld [vmem:[%s3194_s0 + $0x8] sm:$0xff] }
  0x13   :  { %1628 = vmatpush.bf16.msra.mxu0 %v2778_v12  ;;  %v2829_v38 = vld [vmem:[#allocation2 + $0x1b8] sm:$0xff]  ;;  %v61_v41 = vpack.c.bf16 %v37_v34, %v37_v34  ;;  %v64_v42 = vpack.c.bf16 %v40_v36, %v40_v36  ;;  %v62_v43 = vpack.c.bf16 %v38_v37, %v38_v37  ;;  %v2812_v44 = vld [vmem:[#allocation2 + $0x130] sm:$0xff]  ;;  %v2811_v48 = vld [vmem:[#allocation2 + $0x128] sm:$0xff] }
  0x14   :  { %1641 = vmatpush.bf16.msra.mxu1 %v2786_v13  ;;  %v2837_v39 = vld [vmem:[#allocation2 + $0x1f8] sm:$0xff]  ;;  %v2820_v45 = vld [vmem:[#allocation2 + $0x170] sm:$0xff]  ;;  %v2819_v49 = vld [vmem:[#allocation2 + $0x168] sm:$0xff] }
  0x15   :  { %1654 = vmatpush.bf16.msra.mxu2 %v2794_v14  ;;  %v2828_v46 = vld [vmem:[#allocation2 + $0x1b0] sm:$0xff]  ;;  %v2827_v50 = vld [vmem:[#allocation2 + $0x1a8] sm:$0xff]  ;;  %v2810_v52 = vld [vmem:[#allocation2 + $0x120] sm:$0xff] }
  0x16   :  { %1667 = vmatpush.bf16.msra.mxu3 %v2802_v15  ;;  %v2836_v47 = vld [vmem:[#allocation2 + $0x1f0] sm:$0xff]  ;;  %v2835_v51 = vld [vmem:[#allocation2 + $0x1e8] sm:$0xff]  ;;  %v2818_v53 = vld [vmem:[#allocation2 + $0x160] sm:$0xff] }
  0x17   :  { %1629 = vmatpush.bf16.msra.mxu0 %v2777_v16  ;;  %v2826_v54 = vld [vmem:[#allocation2 + $0x1a0] sm:$0xff]  ;;  %v2809_v56 = vld [vmem:[#allocation2 + $0x118] sm:$0xff]  ;;  %v2808_v60 = vld [vmem:[#allocation2 + $0x110] sm:$0xff] }
  0x18   :  { %1642 = vmatpush.bf16.msra.mxu1 %v2785_v17  ;;  %v2834_v55 = vld [vmem:[#allocation2 + $0x1e0] sm:$0xff]  ;;  %v2817_v57 = vld [vmem:[#allocation2 + $0x158] sm:$0xff]  ;;  %v2816_v61 = vld [vmem:[#allocation2 + $0x150] sm:$0xff] }
  0x19   :  { %1655 = vmatpush.bf16.msra.mxu2 %v2793_v18  ;;  %v2825_v58 = vld [vmem:[#allocation2 + $0x198] sm:$0xff]  ;;  %v2824_v62 = vld [vmem:[#allocation2 + $0x190] sm:$0xff]  ;;  %v2807_v0 = vld [vmem:[#allocation2 + $0x108] sm:$0xff] }
  0x1a   :  { %1668 = vmatpush.bf16.msra.mxu3 %v2801_v19  ;;  %v2833_v59 = vld [vmem:[#allocation2 + $0x1d8] sm:$0xff]  ;;  %v2832_v63 = vld [vmem:[#allocation2 + $0x1d0] sm:$0xff]  ;;  %v2815_v1 = vld [vmem:[#allocation2 + $0x148] sm:$0xff] }
  0x1b   :  { %1630 = vmatpush.bf16.msra.mxu0 %v2776_v20  ;;  %v2823_v2 = vld [vmem:[#allocation2 + $0x188] sm:$0xff]  ;;  %v2806_v4 = vld [vmem:[#allocation2 + $0x100] sm:$0xff]  ;;  %v2845_v8 = vld [vmem:[#allocation2 + $0x238] sm:$0xff] }
  0x1c   :  { %1643 = vmatpush.bf16.msra.mxu1 %v2784_v21  ;;  %v2831_v3 = vld [vmem:[#allocation2 + $0x1c8] sm:$0xff]  ;;  %v2814_v5 = vld [vmem:[#allocation2 + $0x140] sm:$0xff]  ;;  %v43_v9 = vld [vmem:[%s3194_s0 + $0x30] sm:$0xff] }
  0x1d   :  { %1656 = vmatpush.bf16.msra.mxu2 %v2792_v22  ;;  %v2822_v6 = vld [vmem:[#allocation2 + $0x180] sm:$0xff]  ;;  %v2853_v11 = vld [vmem:[#allocation2 + $0x278] sm:$0xff]  ;;  %v42_v13 = vld [vmem:[%s3194_s0 + $0x28] sm:$0xff]  ;;  %v67_v16 = vpack.c.bf16 %v43_v9, %v43_v9 }
  0x1e   :  { %1669 = vmatpush.bf16.msra.mxu3 %v2800_v23  ;;  %v2830_v7 = vld [vmem:[#allocation2 + $0x1c0] sm:$0xff]  ;;  %v44_v12 = vld [vmem:[%s3194_s0 + $0x38] sm:$0xff]  ;;  %v66_v19 = vpack.c.bf16 %v42_v13, %v42_v13  ;;  %v2844_v20 = vld [vmem:[#allocation2 + $0x230] sm:$0xff] }
  0x1f   :  { %1631 = vmatpush.bf16.msra.mxu0 %v2775_v24  ;;  %v41_v10 = vld [vmem:[%s3194_s0 + $0x20] sm:$0xff]  ;;  %v2861_v14 = vld [vmem:[#allocation2 + $0x2b8] sm:$0xff]  ;;  %v68_v18 = vpack.c.bf16 %v44_v12, %v44_v12  ;;  %v2852_v21 = vld [vmem:[#allocation2 + $0x270] sm:$0xff] }
  0x20   :  { %1644 = vmatpush.bf16.msra.mxu1 %v2783_v25  ;;  %v2869_v15 = vld [vmem:[#allocation2 + $0x2f8] sm:$0xff]  ;;  %v65_v17 = vpack.c.bf16 %v41_v10, %v41_v10  ;;  %v2860_v22 = vld [vmem:[#allocation2 + $0x2b0] sm:$0xff]  ;;  %v2843_v24 = vld [vmem:[#allocation2 + $0x228] sm:$0xff] }
  0x21   :  { %1657 = vmatpush.bf16.msra.mxu2 %v2791_v26  ;;  %v2868_v23 = vld [vmem:[#allocation2 + $0x2f0] sm:$0xff]  ;;  %v2851_v25 = vld [vmem:[#allocation2 + $0x268] sm:$0xff]  ;;  %v2849_v33 = vld [vmem:[#allocation2 + $0x258] sm:$0xff] }
  0x22   :  { %1670 = vmatpush.bf16.msra.mxu3 %v2799_v27  ;;  %v2859_v26 = vld [vmem:[#allocation2 + $0x2a8] sm:$0xff]  ;;  %v2857_v34 = vld [vmem:[#allocation2 + $0x298] sm:$0xff]  ;;  %v2840_v36 = vld [vmem:[#allocation2 + $0x210] sm:$0xff] }
  0x23   :  { %1632 = vmatpush.bf16.msra.mxu0 %v2774_v28  ;;  %v2867_v27 = vld [vmem:[#allocation2 + $0x2e8] sm:$0xff]  ;;  %v2842_v28 = vld [vmem:[#allocation2 + $0x220] sm:$0xff]  ;;  %v2848_v37 = vld [vmem:[#allocation2 + $0x250] sm:$0xff] }
  0x24   :  { %1645 = vmatpush.bf16.msra.mxu1 %v2782_v29  ;;  %v2850_v29 = vld [vmem:[#allocation2 + $0x260] sm:$0xff]  ;;  %v2881_v9 = vld [vmem:[#allocation2 + $0x358] sm:$0xff]  ;;  %v2872_v12 = vld [vmem:[#allocation2 + $0x310] sm:$0xff] }
  0x25   :  { %1658 = vmatpush.bf16.msra.mxu2 %v2790_v30  ;;  %v2858_v30 = vld [vmem:[#allocation2 + $0x2a0] sm:$0xff]  ;;  %v2889_v10 = vld [vmem:[#allocation2 + $0x398] sm:$0xff]  ;;  %v2880_v13 = vld [vmem:[#allocation2 + $0x350] sm:$0xff] }
  0x26   :  { %1671 = vmatpush.bf16.msra.mxu3 %v2798_v31  ;;  %1633 = vmatmul.bf16.vlgmr.msra.gmra.mxu0 %v61_v41  ;;  %v2866_v31 = vld [vmem:[#allocation2 + $0x2e0] sm:$0xff]  ;;  %v2847_v41 = vld [vmem:[#allocation2 + $0x248] sm:$0xff] }
  0x27   :  { %1677 = vmatpush.bf16.msrb.mxu0 %v2813_v32  ;;  %1646 = vmatmul.bf16.vlgmr.msra.gmra.mxu1 %v62_v43  ;;  %v2841_v32 = vld [vmem:[#allocation2 + $0x218] sm:$0xff]  ;;  %v2863_v43 = vld [vmem:[#allocation2 + $0x2c8] sm:$0xff] }
  0x28   :  { %1690 = vmatpush.bf16.msrb.mxu1 %v2821_v35  ;;  %1659 = vmatmul.bf16.vlgmr.msra.gmra.mxu2 %v63_v40  ;;  %v2865_v35 = vld [vmem:[#allocation2 + $0x2d8] sm:$0xff]  ;;  %v2839_v40 = vld [vmem:[#allocation2 + $0x208] sm:$0xff] }
  0x29   :  { %1703 = vmatpush.bf16.msrb.mxu2 %v2829_v38  ;;  %1672 = vmatmul.bf16.vlgmr.msra.gmra.mxu3 %v64_v42  ;;  %v2856_v38 = vld [vmem:[#allocation2 + $0x290] sm:$0xff]  ;;  %v2855_v42 = vld [vmem:[#allocation2 + $0x288] sm:$0xff] }
  0x2a   :  { %1716 = vmatpush.bf16.msrb.mxu3 %v2837_v39  ;;  %v2864_v39 = vld [vmem:[#allocation2 + $0x2d0] sm:$0xff] }
  0x2b   :  { %1678 = vmatpush.bf16.msrb.mxu0 %v2812_v44  ;;  %v2838_v44 = vld [vmem:[#allocation2 + $0x200] sm:$0xff] }
  0x2c   :  { %1691 = vmatpush.bf16.msrb.mxu1 %v2820_v45  ;;  %v2846_v45 = vld [vmem:[#allocation2 + $0x240] sm:$0xff] }
  0x2d   :  { %1704 = vmatpush.bf16.msrb.mxu2 %v2828_v46  ;;  %v2854_v46 = vld [vmem:[#allocation2 + $0x280] sm:$0xff] }
  0x2e   :  { %1717 = vmatpush.bf16.msrb.mxu3 %v2836_v47  ;;  %v2862_v47 = vld [vmem:[#allocation2 + $0x2c0] sm:$0xff] }
  0x2f   :  { %1679 = vmatpush.bf16.msrb.mxu0 %v2811_v48  ;;  %v2877_v48 = vld [vmem:[#allocation2 + $0x338] sm:$0xff] }
  0x30   :  { %1692 = vmatpush.bf16.msrb.mxu1 %v2819_v49  ;;  %v45_v49 = vld [vmem:[%s3194_s0 + $0x40] sm:$0xff] }
  0x31   :  { %1705 = vmatpush.bf16.msrb.mxu2 %v2827_v50  ;;  %v47_v50 = vld [vmem:[%s3194_s0 + $0x50] sm:$0xff] }
  0x32   :  { %1718 = vmatpush.bf16.msrb.mxu3 %v2835_v51  ;;  %v2885_v51 = vld [vmem:[#allocation2 + $0x378] sm:$0xff] }
  0x33   :  { %1680 = vmatpush.bf16.msrb.mxu0 %v2810_v52  ;;  %v46_v52 = vld [vmem:[%s3194_s0 + $0x48] sm:$0xff] }
  0x34   :  { %1693 = vmatpush.bf16.msrb.mxu1 %v2818_v53  ;;  %v48_v53 = vld [vmem:[%s3194_s0 + $0x58] sm:$0xff] }
  0x35   :  { %1706 = vmatpush.bf16.msrb.mxu2 %v2826_v54  ;;  %v2893_v54 = vld [vmem:[#allocation2 + $0x3b8] sm:$0xff] }
  0x36   :  { %1719 = vmatpush.bf16.msrb.mxu3 %v2834_v55  ;;  %v2901_v55 = vld [vmem:[#allocation2 + $0x3f8] sm:$0xff] }
  0x37   :  { %1681 = vmatpush.bf16.msrb.mxu0 %v2809_v56  ;;  %v69_v56 = vpack.c.bf16 %v45_v49, %v45_v49  ;;  %v2913_v49 = vld [vmem:[#allocation2 + $0x458] sm:$0xff] }
  0x38   :  { %1694 = vmatpush.bf16.msrb.mxu1 %v2817_v57  ;;  %v71_v57 = vpack.c.bf16 %v47_v50, %v47_v50  ;;  %v2921_v50 = vld [vmem:[#allocation2 + $0x498] sm:$0xff] }
  0x39   :  { %1707 = vmatpush.bf16.msrb.mxu2 %v2825_v58  ;;  %v70_v58 = vpack.c.bf16 %v46_v52, %v46_v52  ;;  %v2904_v52 = vld [vmem:[#allocation2 + $0x410] sm:$0xff] }
  0x3a   :  { %1720 = vmatpush.bf16.msrb.mxu3 %v2833_v59  ;;  %v72_v59 = vpack.c.bf16 %v48_v53, %v48_v53  ;;  %v2912_v53 = vld [vmem:[#allocation2 + $0x450] sm:$0xff] }
  0x3b   :  { %1682 = vmatpush.bf16.msrb.mxu0 %v2808_v60  ;;  %v2876_v60 = vld [vmem:[#allocation2 + $0x330] sm:$0xff] }
  0x3c   :  { %1695 = vmatpush.bf16.msrb.mxu1 %v2816_v61  ;;  %v2884_v61 = vld [vmem:[#allocation2 + $0x370] sm:$0xff] }
  0x3d   :  { %1708 = vmatpush.bf16.msrb.mxu2 %v2824_v62  ;;  %v2892_v62 = vld [vmem:[#allocation2 + $0x3b0] sm:$0xff] }
  0x3e   :  { %1721 = vmatpush.bf16.msrb.mxu3 %v2832_v63  ;;  %v2900_v63 = vld [vmem:[#allocation2 + $0x3f0] sm:$0xff] }
  0x3f   :  { %1683 = vmatpush.bf16.msrb.mxu0 %v2807_v0  ;;  %v2875_v0 = vld [vmem:[#allocation2 + $0x328] sm:$0xff] }
  0x40   :  { %1696 = vmatpush.bf16.msrb.mxu1 %v2815_v1  ;;  %v2883_v1 = vld [vmem:[#allocation2 + $0x368] sm:$0xff] }
  0x41   :  { %1709 = vmatpush.bf16.msrb.mxu2 %v2823_v2  ;;  %v2891_v2 = vld [vmem:[#allocation2 + $0x3a8] sm:$0xff] }
  0x42   :  { %1722 = vmatpush.bf16.msrb.mxu3 %v2831_v3  ;;  %v2899_v3 = vld [vmem:[#allocation2 + $0x3e8] sm:$0xff] }
  0x43   :  { %1684 = vmatpush.bf16.msrb.mxu0 %v2806_v4  ;;  %v2874_v4 = vld [vmem:[#allocation2 + $0x320] sm:$0xff] }
  0x44   :  { %1697 = vmatpush.bf16.msrb.mxu1 %v2814_v5  ;;  %v2882_v5 = vld [vmem:[#allocation2 + $0x360] sm:$0xff] }
  0x45   :  { %1710 = vmatpush.bf16.msrb.mxu2 %v2822_v6  ;;  %v2890_v6 = vld [vmem:[#allocation2 + $0x3a0] sm:$0xff] }
  0x46   :  { %1723 = vmatpush.bf16.msrb.mxu3 %v2830_v7  ;;  %1685 = vmatmul.bf16.vlgmr.msrb.gmra.mxu0 %v65_v17  ;;  %v2898_v7 = vld [vmem:[#allocation2 + $0x3e0] sm:$0xff]  ;;  %v2879_v17 = vld [vmem:[#allocation2 + $0x348] sm:$0xff] }
  0x47   :  { %1729 = vmatpush.bf16.msra.mxu0 %v2845_v8  ;;  %1698 = vmatmul.bf16.vlgmr.msrb.gmra.mxu1 %v66_v19  ;;  %v2873_v8 = vld [vmem:[#allocation2 + $0x318] sm:$0xff]  ;;  %v2895_v19 = vld [vmem:[#allocation2 + $0x3c8] sm:$0xff] }
  0x48   :  { %1742 = vmatpush.bf16.msra.mxu1 %v2853_v11  ;;  %1711 = vmatmul.bf16.vlgmr.msrb.gmra.mxu2 %v67_v16  ;;  %v2897_v11 = vld [vmem:[#allocation2 + $0x3d8] sm:$0xff]  ;;  %v2871_v16 = vld [vmem:[#allocation2 + $0x308] sm:$0xff] }
  0x49   :  { %1755 = vmatpush.bf16.msra.mxu2 %v2861_v14  ;;  %1724 = vmatmul.bf16.vlgmr.msrb.gmra.mxu3 %v68_v18  ;;  %v2888_v14 = vld [vmem:[#allocation2 + $0x390] sm:$0xff]  ;;  %v2887_v18 = vld [vmem:[#allocation2 + $0x388] sm:$0xff] }
  0x4a   :  { %1768 = vmatpush.bf16.msra.mxu3 %v2869_v15  ;;  %v2896_v15 = vld [vmem:[#allocation2 + $0x3d0] sm:$0xff] }
  0x4b   :  { %1730 = vmatpush.bf16.msra.mxu0 %v2844_v20  ;;  %v2870_v20 = vld [vmem:[#allocation2 + $0x300] sm:$0xff] }
  0x4c   :  { %1743 = vmatpush.bf16.msra.mxu1 %v2852_v21  ;;  %v2878_v21 = vld [vmem:[#allocation2 + $0x340] sm:$0xff] }
  0x4d   :  { %1756 = vmatpush.bf16.msra.mxu2 %v2860_v22  ;;  %v2886_v22 = vld [vmem:[#allocation2 + $0x380] sm:$0xff] }
  0x4e   :  { %1769 = vmatpush.bf16.msra.mxu3 %v2868_v23  ;;  %v2894_v23 = vld [vmem:[#allocation2 + $0x3c0] sm:$0xff] }
  0x4f   :  { %1731 = vmatpush.bf16.msra.mxu0 %v2843_v24  ;;  %v2909_v24 = vld [vmem:[#allocation2 + $0x438] sm:$0xff] }
  0x50   :  { %1744 = vmatpush.bf16.msra.mxu1 %v2851_v25  ;;  %v49_v25 = vld [vmem:[%s3194_s0 + $0x60] sm:$0xff] }
  0x51   :  { %1757 = vmatpush.bf16.msra.mxu2 %v2859_v26  ;;  %v51_v26 = vld [vmem:[%s3194_s0 + $0x70] sm:$0xff] }
  0x52   :  { %1770 = vmatpush.bf16.msra.mxu3 %v2867_v27  ;;  %v2917_v27 = vld [vmem:[#allocation2 + $0x478] sm:$0xff] }
  0x53   :  { %1732 = vmatpush.bf16.msra.mxu0 %v2842_v28  ;;  %v50_v28 = vld [vmem:[%s3194_s0 + $0x68] sm:$0xff] }
  0x54   :  { %1745 = vmatpush.bf16.msra.mxu1 %v2850_v29  ;;  %v52_v29 = vld [vmem:[%s3194_s0 + $0x78] sm:$0xff] }
  0x55   :  { %1758 = vmatpush.bf16.msra.mxu2 %v2858_v30  ;;  %v2925_v30 = vld [vmem:[#allocation2 + $0x4b8] sm:$0xff] }
  0x56   :  { %1771 = vmatpush.bf16.msra.mxu3 %v2866_v31  ;;  %v2933_v31 = vld [vmem:[#allocation2 + $0x4f8] sm:$0xff] }
  0x57   :  { %1733 = vmatpush.bf16.msra.mxu0 %v2841_v32  ;;  %v73_v32 = vpack.c.bf16 %v49_v25, %v49_v25 }
  0x58   :  { %1746 = vmatpush.bf16.msra.mxu1 %v2849_v33  ;;  %v75_v33 = vpack.c.bf16 %v51_v26, %v51_v26  ;;  %v2954_v26 = vld [vmem:[#allocation2 + $0x5a0] sm:$0xff] }
  0x59   :  { %1759 = vmatpush.bf16.msra.mxu2 %v2857_v34  ;;  %v74_v34 = vpack.c.bf16 %v50_v28, %v50_v28 }
  0x5a   :  { %1772 = vmatpush.bf16.msra.mxu3 %v2865_v35  ;;  %v76_v35 = vpack.c.bf16 %v52_v29, %v52_v29  ;;  %v2937_v29 = vld [vmem:[#allocation2 + $0x518] sm:$0xff] }
  0x5b   :  { %1734 = vmatpush.bf16.msra.mxu0 %v2840_v36  ;;  %v2908_v36 = vld [vmem:[#allocation2 + $0x430] sm:$0xff] }
  0x5c   :  { %1747 = vmatpush.bf16.msra.mxu1 %v2848_v37  ;;  %v2916_v37 = vld [vmem:[#allocation2 + $0x470] sm:$0xff] }
  0x5d   :  { %1760 = vmatpush.bf16.msra.mxu2 %v2856_v38  ;;  %v2924_v38 = vld [vmem:[#allocation2 + $0x4b0] sm:$0xff] }
  0x5e   :  { %1773 = vmatpush.bf16.msra.mxu3 %v2864_v39  ;;  %v2932_v39 = vld [vmem:[#allocation2 + $0x4f0] sm:$0xff] }
  0x5f   :  { %1735 = vmatpush.bf16.msra.mxu0 %v2839_v40  ;;  %v2907_v40 = vld [vmem:[#allocation2 + $0x428] sm:$0xff] }
  0x60   :  { %1748 = vmatpush.bf16.msra.mxu1 %v2847_v41  ;;  %v2915_v41 = vld [vmem:[#allocation2 + $0x468] sm:$0xff] }
  0x61   :  { %1761 = vmatpush.bf16.msra.mxu2 %v2855_v42  ;;  %v2923_v42 = vld [vmem:[#allocation2 + $0x4a8] sm:$0xff] }
  0x62   :  { %1774 = vmatpush.bf16.msra.mxu3 %v2863_v43  ;;  %v2931_v43 = vld [vmem:[#allocation2 + $0x4e8] sm:$0xff] }
  0x63   :  { %1736 = vmatpush.bf16.msra.mxu0 %v2838_v44  ;;  %v2906_v44 = vld [vmem:[#allocation2 + $0x420] sm:$0xff] }
  0x64   :  { %1749 = vmatpush.bf16.msra.mxu1 %v2846_v45  ;;  %v2914_v45 = vld [vmem:[#allocation2 + $0x460] sm:$0xff] }
  0x65   :  { %1762 = vmatpush.bf16.msra.mxu2 %v2854_v46  ;;  %v2922_v46 = vld [vmem:[#allocation2 + $0x4a0] sm:$0xff] }
  0x66   :  { %1775 = vmatpush.bf16.msra.mxu3 %v2862_v47  ;;  %1737 = vmatmul.bf16.vlgmr.msra.gmra.mxu0 %v69_v56  ;;  %v2930_v47 = vld [vmem:[#allocation2 + $0x4e0] sm:$0xff]  ;;  %v2903_v56 = vld [vmem:[#allocation2 + $0x408] sm:$0xff] }
  0x67   :  { %1781 = vmatpush.bf16.msrb.mxu0 %v2877_v48  ;;  %1750 = vmatmul.bf16.vlgmr.msra.gmra.mxu1 %v70_v58  ;;  %v2905_v48 = vld [vmem:[#allocation2 + $0x418] sm:$0xff]  ;;  %v2919_v58 = vld [vmem:[#allocation2 + $0x488] sm:$0xff] }
  0x68   :  { %1794 = vmatpush.bf16.msrb.mxu1 %v2885_v51  ;;  %1763 = vmatmul.bf16.vlgmr.msra.gmra.mxu2 %v71_v57  ;;  %v2929_v51 = vld [vmem:[#allocation2 + $0x4d8] sm:$0xff]  ;;  %v2911_v57 = vld [vmem:[#allocation2 + $0x448] sm:$0xff] }
  0x69   :  { %1807 = vmatpush.bf16.msrb.mxu2 %v2893_v54  ;;  %1776 = vmatmul.bf16.vlgmr.msra.gmra.mxu3 %v72_v59  ;;  %v2920_v54 = vld [vmem:[#allocation2 + $0x490] sm:$0xff]  ;;  %v2927_v59 = vld [vmem:[#allocation2 + $0x4c8] sm:$0xff] }
  0x6a   :  { %1820 = vmatpush.bf16.msrb.mxu3 %v2901_v55  ;;  %v2928_v55 = vld [vmem:[#allocation2 + $0x4d0] sm:$0xff] }
  0x6b   :  { %1782 = vmatpush.bf16.msrb.mxu0 %v2876_v60  ;;  %v2902_v60 = vld [vmem:[#allocation2 + $0x400] sm:$0xff] }
  0x6c   :  { %1795 = vmatpush.bf16.msrb.mxu1 %v2884_v61  ;;  %v2910_v61 = vld [vmem:[#allocation2 + $0x440] sm:$0xff] }
  0x6d   :  { %1808 = vmatpush.bf16.msrb.mxu2 %v2892_v62  ;;  %v2918_v62 = vld [vmem:[#allocation2 + $0x480] sm:$0xff] }
  0x6e   :  { %1821 = vmatpush.bf16.msrb.mxu3 %v2900_v63  ;;  %v2926_v63 = vld [vmem:[#allocation2 + $0x4c0] sm:$0xff] }
  0x6f   :  { %1783 = vmatpush.bf16.msrb.mxu0 %v2875_v0  ;;  %v2941_v0 = vld [vmem:[#allocation2 + $0x538] sm:$0xff] }
  0x70   :  { %1796 = vmatpush.bf16.msrb.mxu1 %v2883_v1  ;;  %v53_v1 = vld [vmem:[%s3194_s0 + $0x80] sm:$0xff] }
  0x71   :  { %1809 = vmatpush.bf16.msrb.mxu2 %v2891_v2  ;;  %v55_v2 = vld [vmem:[%s3194_s0 + $0x90] sm:$0xff] }
  0x72   :  { %1822 = vmatpush.bf16.msrb.mxu3 %v2899_v3  ;;  %v2949_v3 = vld [vmem:[#allocation2 + $0x578] sm:$0xff] }
  0x73   :  { %1784 = vmatpush.bf16.msrb.mxu0 %v2874_v4  ;;  %v54_v4 = vld [vmem:[%s3194_s0 + $0x88] sm:$0xff] }
  0x74   :  { %1797 = vmatpush.bf16.msrb.mxu1 %v2882_v5  ;;  %v56_v5 = vld [vmem:[%s3194_s0 + $0x98] sm:$0xff] }
  0x75   :  { %1810 = vmatpush.bf16.msrb.mxu2 %v2890_v6  ;;  %v2957_v6 = vld [vmem:[#allocation2 + $0x5b8] sm:$0xff] }
  0x76   :  { %1823 = vmatpush.bf16.msrb.mxu3 %v2898_v7  ;;  %v2965_v7 = vld [vmem:[#allocation2 + $0x5f8] sm:$0xff] }
  0x77   :  { %1785 = vmatpush.bf16.msrb.mxu0 %v2873_v8  ;;  %v77_v8 = vpack.c.bf16 %v53_v1, %v53_v1 }
  0x78   :  { %1798 = vmatpush.bf16.msrb.mxu1 %v2881_v9  ;;  %v79_v9 = vpack.c.bf16 %v55_v2, %v55_v2 }
  0x79   :  { %1811 = vmatpush.bf16.msrb.mxu2 %v2889_v10  ;;  %v78_v10 = vpack.c.bf16 %v54_v4, %v54_v4 }
  0x7a   :  { %1824 = vmatpush.bf16.msrb.mxu3 %v2897_v11  ;;  %v80_v11 = vpack.c.bf16 %v56_v5, %v56_v5 }
  0x7b   :  { %1786 = vmatpush.bf16.msrb.mxu0 %v2872_v12  ;;  %v2940_v12 = vld [vmem:[#allocation2 + $0x530] sm:$0xff] }
  0x7c   :  { %1799 = vmatpush.bf16.msrb.mxu1 %v2880_v13  ;;  %v2948_v13 = vld [vmem:[#allocation2 + $0x570] sm:$0xff] }
  0x7d   :  { %1812 = vmatpush.bf16.msrb.mxu2 %v2888_v14  ;;  %v2956_v14 = vld [vmem:[#allocation2 + $0x5b0] sm:$0xff] }
  0x7e   :  { %1825 = vmatpush.bf16.msrb.mxu3 %v2896_v15  ;;  %v2964_v15 = vld [vmem:[#allocation2 + $0x5f0] sm:$0xff] }
  0x7f   :  { %1787 = vmatpush.bf16.msrb.mxu0 %v2871_v16  ;;  %v2939_v16 = vld [vmem:[#allocation2 + $0x528] sm:$0xff] }
  0x80   :  { %1800 = vmatpush.bf16.msrb.mxu1 %v2879_v17  ;;  %v2947_v17 = vld [vmem:[#allocation2 + $0x568] sm:$0xff] }
  0x81   :  { %1813 = vmatpush.bf16.msrb.mxu2 %v2887_v18  ;;  %v2970_v18 = vld [vmem:[%s3196_s2] ss:$0 sm:$0xff] }
  0x82   :  { %1826 = vmatpush.bf16.msrb.mxu3 %v2895_v19  ;;  %v2955_v19 = vld [vmem:[#allocation2 + $0x5a8] sm:$0xff] }
  0x83   :  { %1788 = vmatpush.bf16.msrb.mxu0 %v2870_v20  ;;  %v2963_v20 = vld [vmem:[#allocation2 + $0x5e8] sm:$0xff] }
  0x84   :  { %1801 = vmatpush.bf16.msrb.mxu1 %v2878_v21 }
  0x85   :  { %1814 = vmatpush.bf16.msrb.mxu2 %v2886_v22  ;;  %v2938_v22 = vld [vmem:[#allocation2 + $0x520] sm:$0xff] }
  0x86   :  { %1827 = vmatpush.bf16.msrb.mxu3 %v2894_v23  ;;  %1789 = vmatmul.bf16.vlgmr.msrb.gmra.mxu0 %v73_v32  ;;  %v2946_v23 = vld [vmem:[#allocation2 + $0x560] sm:$0xff]  ;;  %v2961_v32 = vld [vmem:[#allocation2 + $0x5d8] sm:$0xff] }
  0x87   :  { %1833 = vmatpush.bf16.msra.mxu0 %v2909_v24  ;;  %1802 = vmatmul.bf16.vlgmr.msrb.gmra.mxu1 %v74_v34 }
  0x88   :  { %1846 = vmatpush.bf16.msra.mxu1 %v2917_v27  ;;  %1815 = vmatmul.bf16.vlgmr.msrb.gmra.mxu2 %v75_v33  ;;  %v2962_v27 = vld [vmem:[#allocation2 + $0x5e0] sm:$0xff] }
  0x89   :  { %1859 = vmatpush.bf16.msra.mxu2 %v2925_v30  ;;  %1828 = vmatmul.bf16.vlgmr.msrb.gmra.mxu3 %v76_v35  ;;  %v2945_v30 = vld [vmem:[#allocation2 + $0x558] sm:$0xff] }
  0x8a   :  { %1872 = vmatpush.bf16.msra.mxu3 %v2933_v31  ;;  %v2953_v31 = vld [vmem:[#allocation2 + $0x598] sm:$0xff] }
  0x8b   :  { %1834 = vmatpush.bf16.msra.mxu0 %v2908_v36 }
  0x8c   :  { %1847 = vmatpush.bf16.msra.mxu1 %v2916_v37  ;;  %v2936_v37 = vld [vmem:[#allocation2 + $0x510] sm:$0xff] }
  0x8d   :  { %1860 = vmatpush.bf16.msra.mxu2 %v2924_v38  ;;  %v2944_v38 = vld [vmem:[#allocation2 + $0x550] sm:$0xff] }
  0x8e   :  { %1873 = vmatpush.bf16.msra.mxu3 %v2932_v39 }
  0x8f   :  { %1835 = vmatpush.bf16.msra.mxu0 %v2907_v40 }
  0x90   :  { %1848 = vmatpush.bf16.msra.mxu1 %v2915_v41  ;;  %v2952_v41 = vld [vmem:[#allocation2 + $0x590] sm:$0xff] }
  0x91   :  { %1861 = vmatpush.bf16.msra.mxu2 %v2923_v42  ;;  %v2960_v42 = vld [vmem:[#allocation2 + $0x5d0] sm:$0xff] }
  0x92   :  { %1874 = vmatpush.bf16.msra.mxu3 %v2931_v43  ;;  %v2935_v43 = vld [vmem:[#allocation2 + $0x508] sm:$0xff] }
  0x93   :  { %1836 = vmatpush.bf16.msra.mxu0 %v2906_v44  ;;  %v2943_v44 = vld [vmem:[#allocation2 + $0x548] sm:$0xff] }
  0x94   :  { %1849 = vmatpush.bf16.msra.mxu1 %v2914_v45  ;;  %v2951_v45 = vld [vmem:[#allocation2 + $0x588] sm:$0xff] }
  0x95   :  { %1862 = vmatpush.bf16.msra.mxu2 %v2922_v46  ;;  %v2959_v46 = vld [vmem:[#allocation2 + $0x5c8] sm:$0xff] }
  0x96   :  { %1875 = vmatpush.bf16.msra.mxu3 %v2930_v47 }
  0x97   :  { %1837 = vmatpush.bf16.msra.mxu0 %v2905_v48 }
  0x98   :  { %1850 = vmatpush.bf16.msra.mxu1 %v2913_v49  ;;  %v2934_v49 = vld [vmem:[#allocation2 + $0x500] sm:$0xff] }
  0x99   :  { %1863 = vmatpush.bf16.msra.mxu2 %v2921_v50  ;;  %v2942_v50 = vld [vmem:[#allocation2 + $0x540] sm:$0xff] }
  0x9a   :  { %1876 = vmatpush.bf16.msra.mxu3 %v2929_v51  ;;  %v2950_v51 = vld [vmem:[#allocation2 + $0x580] sm:$0xff] }
  0x9b   :  { %1838 = vmatpush.bf16.msra.mxu0 %v2904_v52  ;;  %v57_v52 = vld [vmem:[%s3194_s0 + $0xa0] sm:$0xff] }
  0x9c   :  { %1851 = vmatpush.bf16.msra.mxu1 %v2912_v53  ;;  %v58_v53 = vld [vmem:[%s3194_s0 + $0xa8] sm:$0xff] }
  0x9d   :  { %1864 = vmatpush.bf16.msra.mxu2 %v2920_v54  ;;  %v2958_v54 = vld [vmem:[#allocation2 + $0x5c0] sm:$0xff] }
  0x9e   :  { %1877 = vmatpush.bf16.msra.mxu3 %v2928_v55  ;;  %v59_v55 = vld [vmem:[%s3194_s0 + $0xb0] sm:$0xff] }
  0x9f   :  { %1839 = vmatpush.bf16.msra.mxu0 %v2903_v56  ;;  %v60_v56 = vld [vmem:[%s3194_s0 + $0xb8] sm:$0xff] }
  0xa0   :  { %1852 = vmatpush.bf16.msra.mxu1 %v2911_v57  ;;  %v81_v57 = vpack.c.bf16 %v57_v52, %v57_v52 }
  0xa1   :  { %1865 = vmatpush.bf16.msra.mxu2 %v2919_v58  ;;  %v82_v58 = vpack.c.bf16 %v58_v53, %v58_v53 }
  0xa2   :  { %1878 = vmatpush.bf16.msra.mxu3 %v2927_v59  ;;  %v83_v59 = vpack.c.bf16 %v59_v55, %v59_v55 }
  0xa3   :  { %1840 = vmatpush.bf16.msra.mxu0 %v2902_v60  ;;  %v1634_v21 = vpop.f32.mrf.mxu0  ;;  %v84_v60 = vpack.c.bf16 %v60_v56, %v60_v56 }
  0xa4   :  { %1853 = vmatpush.bf16.msra.mxu1 %v2910_v61  ;;  %v1635_v24 = vadd.f32 %v2970_v18, %v1634_v21  ;;  %v1647_v25 = vpop.f32.mrf.mxu1 }
  0xa5   :  { %1866 = vmatpush.bf16.msra.mxu2 %v2918_v62 }
  0xa6   :  { %1879 = vmatpush.bf16.msra.mxu3 %v2926_v63  ;;  %1841 = vmatmul.bf16.vlgmr.msra.gmra.mxu0 %v77_v8  ;;  %v1648_v28 = vadd.f32 %v1647_v25, %v1635_v24  ;;  %v1953_v25 = vld [vmem:[%s3197_s3 + $0x78] sm:$0xff] }
  0xa7   :  { %1885 = vmatpush.bf16.msrb.mxu0 %v2941_v0  ;;  %1854 = vmatmul.bf16.vlgmr.msra.gmra.mxu1 %v78_v10 }
  0xa8   :  { %1898 = vmatpush.bf16.msrb.mxu1 %v2949_v3  ;;  %1867 = vmatmul.bf16.vlgmr.msra.gmra.mxu2 %v79_v9 }
  0xa9   :  { %1911 = vmatpush.bf16.msrb.mxu2 %v2957_v6  ;;  %1880 = vmatmul.bf16.vlgmr.msra.gmra.mxu3 %v80_v11 }
  0xaa   :  { %1924 = vmatpush.bf16.msrb.mxu3 %v2965_v7 }
  0xab   :  { %1886 = vmatpush.bf16.msrb.mxu0 %v2940_v12  ;;  %v1660_v33 = vpop.f32.mrf.mxu2  ;;  %v1636_v36 = vpop.f32.mrf.mxu0 }
  0xac   :  { %1899 = vmatpush.bf16.msrb.mxu1 %v2948_v13  ;;  %v1661_v34 = vadd.f32 %v1660_v33, %v1648_v28  ;;  %v1673_v35 = vpop.f32.mrf.mxu3  ;;  %v1649_v40 = vpop.f32.mrf.mxu1  ;;  %v1946_v36 = vld [vmem:[%s3197_s3 + $0x40] sm:$0xff] }
  0xad   :  { %1912 = vmatpush.bf16.msrb.mxu2 %v2956_v14 }
  0xae   :  { %1925 = vmatpush.bf16.msrb.mxu3 %v2964_v15  ;;  %v1674_v39 = vadd.f32 %v1673_v35, %v1661_v34  ;;  %v1948_v34 = vld [vmem:[%s3197_s3 + $0x50] sm:$0xff]  ;;  %v1947_v35 = vld [vmem:[%s3197_s3 + $0x48] sm:$0xff] }
  0xaf   :  { %1887 = vmatpush.bf16.msrb.mxu0 %v2939_v16 }
  0xb0   :  { %1900 = vmatpush.bf16.msrb.mxu1 %v2947_v17 }
  0xb1   :  { %1913 = vmatpush.bf16.msrb.mxu2 %v2955_v19 }
  0xb2   :  { %1926 = vmatpush.bf16.msrb.mxu3 %v2963_v20 }
  0xb3   :  { %1888 = vmatpush.bf16.msrb.mxu0 %v2938_v22  ;;  %v1662_v47 = vpop.f32.mrf.mxu2 }
  0xb4   :  { %1901 = vmatpush.bf16.msrb.mxu1 %v2946_v23  ;;  %v1675_v48 = vpop.f32.mrf.mxu3 }
  0xb5   :  { %1914 = vmatpush.bf16.msrb.mxu2 %v2954_v26  ;;  %v1952_v26 = vld [vmem:[%s3197_s3 + $0x70] sm:$0xff]  ;;  %v1939_v48 = vld [vmem:[%s3197_s3 + $0x8] sm:$0xff] }
  0xb6   :  { %1927 = vmatpush.bf16.msrb.mxu3 %v2962_v27 }
  0xb7   :  { %1889 = vmatpush.bf16.msrb.mxu0 %v2937_v29  ;;  %v1951_v29 = vld [vmem:[%s3197_s3 + $0x68] sm:$0xff] }
  0xb8   :  { %1902 = vmatpush.bf16.msrb.mxu1 %v2945_v30  ;;  %v1950_v30 = vld [vmem:[%s3197_s3 + $0x60] sm:$0xff] }
  0xb9   :  { %1915 = vmatpush.bf16.msrb.mxu2 %v2953_v31  ;;  %v1949_v31 = vld [vmem:[%s3197_s3 + $0x58] sm:$0xff] }
  0xba   :  { %1928 = vmatpush.bf16.msrb.mxu3 %v2961_v32 }
  0xbb   :  { %1890 = vmatpush.bf16.msrb.mxu0 %v2936_v37  ;;  %v1945_v37 = vld [vmem:[%s3197_s3 + $0x38] sm:$0xff] }
  0xbc   :  { %1903 = vmatpush.bf16.msrb.mxu1 %v2944_v38  ;;  %v1944_v38 = vld [vmem:[%s3197_s3 + $0x30] sm:$0xff] }
  0xbd   :  { %1916 = vmatpush.bf16.msrb.mxu2 %v2952_v41  ;;  %v1942_v41 = vld [vmem:[%s3197_s3 + $0x20] sm:$0xff] }
  0xbe   :  { %1929 = vmatpush.bf16.msrb.mxu3 %v2960_v42 }
  0xbf   :  { %1891 = vmatpush.bf16.msrb.mxu0 %v2935_v43  ;;  %v1941_v43 = vld [vmem:[%s3197_s3 + $0x18] sm:$0xff] }
  0xc0   :  { %1904 = vmatpush.bf16.msrb.mxu1 %v2943_v44  ;;  %v1940_v44 = vld [vmem:[%s3197_s3 + $0x10] sm:$0xff] }
  0xc1   :  { %1917 = vmatpush.bf16.msrb.mxu2 %v2951_v45 }
  0xc2   :  { %1930 = vmatpush.bf16.msrb.mxu3 %v2959_v46 }
  0xc3   :  { %1892 = vmatpush.bf16.msrb.mxu0 %v2934_v49  ;;  %v1686_v61 = vpop.f32.mrf.mxu0 }
  0xc4   :  { %1905 = vmatpush.bf16.msrb.mxu1 %v2942_v50  ;;  %v1687_v62 = vadd.f32 %v1686_v61, %v1674_v39  ;;  %v1699_v63 = vpop.f32.mrf.mxu1  ;;  %v1943_v39 = vld [vmem:[%s3197_s3 + $0x28] sm:$0xff] }
  0xc5   :  { %1918 = vmatpush.bf16.msrb.mxu2 %v2950_v51  ;;  %v1938_v51 = vld [vmem:[%s3197_s3] sm:$0xff] }
  0xc6   :  { %1931 = vmatpush.bf16.msrb.mxu3 %v2958_v54  ;;  %1893 = vmatmul.bf16.vlgmr.msrb.gmra.mxu0 %v81_v57  ;;  %v1700_v0 = vadd.f32 %v1699_v63, %v1687_v62 }
  0xc7   :  { %1906 = vmatmul.bf16.vlgmr.msrb.gmra.mxu1 %v82_v58  ;;  %1958 = vmatpush.msra.mxu0 %v1953_v25 }
  0xc8   :  { %1919 = vmatmul.bf16.vlgmr.msrb.gmra.mxu2 %v83_v59 }
  0xc9   :  { %1932 = vmatmul.bf16.vlgmr.msrb.gmra.mxu3 %v84_v60  ;;  %1959 = vmatpush.msra.mxu0 %v1952_v26 }
  0xcb   :  { %v1712_v1 = vpop.f32.mrf.mxu2  ;;  %v1688_v4 = vpop.f32.mrf.mxu0  ;;  %1960 = vmatpush.msra.mxu0 %v1951_v29 }
  0xcc   :  { %v1713_v2 = vadd.f32 %v1712_v1, %v1700_v0  ;;  %v1725_v3 = vpop.f32.mrf.mxu3  ;;  %v1701_v6 = vpop.f32.mrf.mxu1 }
  0xcd   :  { %1961 = vmatpush.msra.mxu0 %v1950_v30 }
  0xce   :  { %v1726_v5 = vadd.f32 %v1725_v3, %v1713_v2 }
  0xcf   :  { %1962 = vmatpush.msra.mxu0 %v1949_v31 }
  0xd1   :  { %1963 = vmatpush.msra.mxu0 %v1948_v34 }
  0xd3   :  { %v1714_v7 = vpop.f32.mrf.mxu2  ;;  %1964 = vmatpush.msra.mxu0 %v1947_v35 }
  0xd4   :  { %v1727_v8 = vpop.f32.mrf.mxu3 }
  0xd5   :  { %1965 = vmatpush.msra.mxu0 %v1946_v36 }
  0xd7   :  { %1966 = vmatpush.msra.mxu0 %v1945_v37 }
  0xd9   :  { %1967 = vmatpush.msra.mxu0 %v1944_v38 }
  0xdb   :  { %1968 = vmatpush.msra.mxu0 %v1943_v39 }
  0xdd   :  { %1969 = vmatpush.msra.mxu0 %v1942_v41 }
  0xdf   :  { %1970 = vmatpush.msra.mxu0 %v1941_v43 }
  0xe1   :  { %1971 = vmatpush.msra.mxu0 %v1940_v44 }
  0xe3   :  { %v1738_v9 = vpop.f32.mrf.mxu0  ;;  %1972 = vmatpush.msra.mxu0 %v1939_v48 }
  0xe4   :  { %v1739_v10 = vadd.f32 %v1738_v9, %v1726_v5  ;;  %v1751_v11 = vpop.f32.mrf.mxu1 }
  0xe5   :  { %1973 = vmatpush.msra.mxu0 %v1938_v51 }
  0xe6   :  { %v1752_v12 = vadd.f32 %v1751_v11, %v1739_v10  ;;  %v2971_v10 = vld [vmem:[%s3198_s4] ss:$0 sm:$0xff] }
  0xeb   :  { %v1764_v13 = vpop.f32.mrf.mxu2  ;;  %v1740_v16 = vpop.f32.mrf.mxu0 }
  0xec   :  { %v1765_v14 = vadd.f32 %v1764_v13, %v1752_v12  ;;  %v1777_v15 = vpop.f32.mrf.mxu3  ;;  %v1753_v18 = vpop.f32.mrf.mxu1 }
  0xee   :  { %v1778_v17 = vadd.f32 %v1777_v15, %v1765_v14 }
  0xf3   :  { %v1766_v19 = vpop.f32.mrf.mxu2 }
  0xf4   :  { %v1779_v20 = vpop.f32.mrf.mxu3 }
 0x103   :  { %v1790_v21 = vpop.f32.mrf.mxu0 }
 0x104   :  { %v1803_v22 = vpop.f32.mrf.mxu1  ;;  %v1791_v46 = vadd.f32 %v1790_v21, %v1778_v17 }
 0x106   :  { %v1804_v52 = vadd.f32 %v1803_v22, %v1791_v46 }
 0x10b   :  { %v1816_v23 = vpop.f32.mrf.mxu2  ;;  %v1792_v27 = vpop.f32.mrf.mxu0 }
 0x10c   :  { %v1829_v24 = vpop.f32.mrf.mxu3  ;;  %v1805_v28 = vpop.f32.mrf.mxu1  ;;  %v1817_v53 = vadd.f32 %v1816_v23, %v1804_v52 }
 0x10e   :  { %v1830_v56 = vadd.f32 %v1829_v24, %v1817_v53 }
 0x113   :  { %v1818_v32 = vpop.f32.mrf.mxu2 }
 0x114   :  { %v1831_v33 = vpop.f32.mrf.mxu3 }
 0x123   :  { %v1842_v40 = vpop.f32.mrf.mxu0 }
 0x124   :  { %v1855_v42 = vpop.f32.mrf.mxu1  ;;  %v1843_v57 = vadd.f32 %v1842_v40, %v1830_v56 }
 0x126   :  { %v1856_v58 = vadd.f32 %v1855_v42, %v1843_v57 }
 0x12b   :  { %v1868_v45 = vpop.f32.mrf.mxu2  ;;  %v1844_v49 = vpop.f32.mrf.mxu0 }
 0x12c   :  { %v1881_v47 = vpop.f32.mrf.mxu3  ;;  %v1857_v50 = vpop.f32.mrf.mxu1  ;;  %v1869_v59 = vadd.f32 %v1868_v45, %v1856_v58 }
 0x12e   :  { %v1882_v60 = vadd.f32 %v1881_v47, %v1869_v59 }
 0x133   :  { %v1870_v54 = vpop.f32.mrf.mxu2 }
 0x134   :  { %v1883_v55 = vpop.f32.mrf.mxu3 }
 0x143   :  { %v1894_v61 = vpop.f32.mrf.mxu0 }
 0x144   :  { %v1907_v62 = vpop.f32.mrf.mxu1  ;;  %v1895_v63 = vadd.f32 %v1894_v61, %v1882_v60 }
 0x146   :  { %v1908_v0 = vadd.f32 %v1907_v62, %v1895_v63 }
 0x14b   :  { %v1920_v1 = vpop.f32.mrf.mxu2  ;;  %v1896_v4 = vpop.f32.mrf.mxu0 }
 0x14c   :  { %v1933_v2 = vpop.f32.mrf.mxu3  ;;  %v1921_v3 = vadd.f32 %v1920_v1, %v1908_v0  ;;  %v1909_v5 = vpop.f32.mrf.mxu1 }
 0x14e   :  { %v1934_v6 = vadd.f32 %v1933_v2, %v1921_v3 }
 0x150   :  { %v1937_v7 = vmax.f32 %v1934_v6, 0.0 }
 0x152   :  { %1974 = vmatmul.f32.vlgmr.msra.gmra.mxu0 %v1937_v7 }
 0x153   :  { %v1922_v8 = vpop.f32.mrf.mxu2 }
 0x154   :  { %v1935_v9 = vpop.f32.mrf.mxu3 }
 0x1cf   :  { %v1975_v11 = vpop.f32.mrf.mxu0 }
 0x1d0   :  { %v1976_v12 = vadd.f32 %v2971_v10, %v1975_v11 }
 0x1d2   :  { %1978 = vmax.xlane.f32.xlu0 %v1976_v12 }
 0x245   :  { %v1979_v13 = vpop.xlane.xlu0 %1978 }
 0x246   :  { %v1980_v14 = vsub.f32 %v1976_v12, %v1979_v13 }
 0x248   :  { %v1981_v15 = vmul.f32 1.442695, %v1980_v14 }
 0x24a   :  { %2972 = vpow2.f32 %v1981_v15 }
 0x250   :  { %v2973_v16 = vpop.eup %2972 }
 0x251   :  { %1983 = vadd.xlane.f32.xlu0 %v2973_v16 }
 0x2c4   :  { %v1984_v17 = vpop.xlane.xlu0 %1983 }
 0x2c5   :  { %2974 = vlog2.f32 %v1984_v17 }
 0x2cb   :  { %v2975_v18 = vpop.eup %2974 }
 0x2cc   :  { %v1986_v19 = vmul.f32 0.6931472, %v2975_v18 }
 0x2ce   :  { %v1987_v20 = vsub.f32 %v1980_v14, %v1986_v19 }
 0x2d0   :  { %1988 = vst [vmem:[#allocation5] sm:$0xff] %v1987_v20 }
 0x2d1   :  { %1999 = dma.vmem_to_hbm [thread:$0]  %s1995_s26, 128, %s1997_s29, [#allocation4]  }
 0x2d2   :  { %3026 = dma.done.wait [#allocation4], 128  }
 0x2d3   :  { %3027 = vsyncadd [#allocation4], 4294967168 }
 0x2d4   :  { %2004 = vsyncpa [#allocation3], 1 }
 0x2d5   :  { %2005 = vsyncpa [#allocation4], 1 }

</bundles_post_ra>
